<compile_context>
chip_gen: v7x
topology: tpu7x:2x2x1
jax: 0.10.0
libtpu: 0.0.40
codegen_flags: <defaults>
</compile_context>

<pallas_src>
import functools

import jax
import jax.numpy as jnp
from jax.experimental import pallas as pl
from jax.experimental.pallas import tpu as pltpu

BN_EPS = 1e-5
NEG_SLOPE = 0.1
LANE = 128
F32 = jnp.float32


# --------------------------------------------------------------------------
# small helpers
# --------------------------------------------------------------------------
def _round_up(n, m):
    return ((n + m - 1) // m) * m


def _pad2(a, rows, cols):
    pr, pc = rows - a.shape[0], cols - a.shape[1]
    return jnp.pad(a, ((0, pr), (0, pc))) if (pr or pc) else a


def _pad_vec(v, cols):
    return _pad2(v.astype(F32).reshape(1, -1), 1, cols)


def _vmem_capacity_bytes():
    try:
        return int(pltpu.get_tpu_info().vmem_capacity_bytes)
    except Exception:
        return 64 * 1024 * 1024          # conservative fallback (v7x per-core)


def _const_spec(shape, index_map):
    """BlockSpec for operands whose block never changes: single-buffered."""
    try:
        return pl.BlockSpec(shape, index_map, pipeline_mode=pl.Buffered(1))
    except Exception:                    # older jax without pipeline_mode
        return pl.BlockSpec(shape, index_map)


def _choose_block_b(batch, emb_p, latent_p, budget):
    """Largest 256-row batch tile whose stage-A working set fits the budget
    (double-buffered x / y tiles, single-buffered bf16 weights)."""
    const = 2 * emb_p * latent_p * 2 + 64 * 4 * (emb_p + latent_p)
    tb = min(_round_up(batch, 256), 4096)
    while tb > 256:
        acts = tb * (2 * emb_p * 2       # x tile  (bf16, double-buffered)
                     + 2 * emb_p * 4     # y tile  (f32, double-buffered)
                     + latent_p * 4      # h intermediate (f32)
                     + emb_p * 4)        # y working copy (f32)
        if const + acts <= budget:
            break
        tb -= 256
    return max(256, tb)


def _choose_pass3_rows(nb_total, block_b, emb_p, out_bytes, budget):
    """Biggest batch tile (a multiple of block_b dividing B_p) for the
    memory-bound BN2+act epilogue."""
    best = 1
    for k in range(1, nb_total + 1):
        if nb_total % k:
            continue
        rows = k * block_b
        if rows * emb_p * (2 * 4 + 2 * out_bytes) + 64 * 4 * emb_p <= budget:
            best = k
    return best * block_b


# --------------------------------------------------------------------------
# fused single-kernel path (whole problem resident in VMEM)
# --------------------------------------------------------------------------
def _fused_kernel(x_ref, w1_ref, g1_ref, b1_ref, w2_ref, g2_ref, b2_ref,
                  o_ref, *, inv_n, n_rows, has_pad, neg_slope, eps):
    h = jnp.dot(x_ref[...], w1_ref[...], preferred_element_type=jnp.float32)
    mean1 = jnp.sum(h, axis=0, keepdims=True) * inv_n
    var1 = jnp.maximum(jnp.sum(h * h, axis=0, keepdims=True) * inv_n
                       - mean1 * mean1, 0.0)
    scale1 = g1_ref[...] * jax.lax.rsqrt(var1 + eps)
    shift1 = b1_ref[...] - mean1 * scale1
    h = h * scale1 + shift1
    h = jnp.maximum(h, neg_slope * h)                 # LeakyReLU(0.1)
    if has_pad:   # zero padded rows so they don't contaminate BN2 statistics
        row = jax.lax.broadcasted_iota(jnp.int32, h.shape, 0)
        h = jnp.where(row < n_rows, h, 0.0)

    y = jnp.dot(h.astype(w2_ref.dtype), w2_ref[...],
                preferred_element_type=jnp.float32)
    mean2 = jnp.sum(y, axis=0, keepdims=True) * inv_n
    var2 = jnp.maximum(jnp.sum(y * y, axis=0, keepdims=True) * inv_n
                       - mean2 * mean2, 0.0)
    scale2 = g2_ref[...] * jax.lax.rsqrt(var2 + eps)
    shift2 = b2_ref[...] - mean2 * scale2
    y = y * scale2 + shift2
    o_ref[...] = jnp.maximum(y, neg_slope * y).astype(o_ref.dtype)


# --------------------------------------------------------------------------
# tiled path, stage A: BN1(folded) + LeakyReLU + Linear2; writes y and
# accumulates per-core partial sums of y in resident VMEM blocks.
# --------------------------------------------------------------------------
def _mid_kernel(x_ref, w1_ref, scale1_ref, shift1_ref, w2_ref,
                y_ref, sum2_ref, sq2_ref, *,
                nb_per, block_b, n_rows, n_full_tiles, has_pad, neg_slope):
    c = pl.program_id(0)          # batch half ("parallel": one per TensorCore)
    i = pl.program_id(1)          # tile within the half ("arbitrary")

    @pl.when(i == 0)
    def _init():
        sum2_ref[...] = jnp.zeros_like(sum2_ref)
        sq2_ref[...] = jnp.zeros_like(sq2_ref)

    h = jnp.dot(x_ref[...], w1_ref[...], preferred_element_type=jnp.float32)
    h = h * scale1_ref[...] + shift1_ref[...]         # folded BatchNorm1d
    h = jnp.maximum(h, neg_slope * h)                 # LeakyReLU(0.1)

    y = jnp.dot(h.astype(w2_ref.dtype), w2_ref[...],
                preferred_element_type=jnp.float32)
    y_ref[...] = y

    def _accumulate(vals):
        sum2_ref[0:1, :] += jnp.sum(vals, axis=0, keepdims=True)
        sq2_ref[0:1, :] += jnp.sum(vals * vals, axis=0, keepdims=True)

    if has_pad:
        t = c * nb_per + i                            # global tile index

        @pl.when(t < n_full_tiles)                    # no padded rows here
        def _():
            _accumulate(y)

        @pl.when(t >= n_full_tiles)                   # tile overlaps padding
        def _():
            row = jax.lax.broadcasted_iota(jnp.int32, y.shape, 0) + t * block_b
            _accumulate(jnp.where(row < n_rows, y, 0.0))
    else:
        _accumulate(y)


# --------------------------------------------------------------------------
# tiled path, stage B: memory-bound BN2(folded) + LeakyReLU epilogue.
# --------------------------------------------------------------------------
def _bn_act_kernel(y_ref, scale_ref, shift_ref, o_ref, *, neg_slope):
    y = y_ref[...] * scale_ref[...] + shift_ref[...]
    o_ref[...] = jnp.maximum(y, neg_slope * y).astype(o_ref.dtype)


# --------------------------------------------------------------------------
# wrapper
# --------------------------------------------------------------------------
@functools.partial(jax.jit,
                   static_argnames=("block_b", "out_dtype", "path",
                                    "matmul_dtype"))
def predictor_forward(x, w1, g1, b1, w2, g2, b2, *, block_b=None,
                      out_dtype=None, path="auto", matmul_dtype=jnp.bfloat16):
    """x: (B, emb). w1: (emb, latent). w2: (latent, emb). g*, b*: (1, feat)."""
    B, emb = x.shape
    latent = w1.shape[1]
    out_dtype = jnp.dtype(out_dtype or x.dtype)
    out_bytes = out_dtype.itemsize

    emb_p = _round_up(emb, LANE)
    latent_p = _round_up(latent, LANE)

    vmem_cap = _vmem_capacity_bytes()
    vmem_limit = min(int(vmem_cap * 0.75), 100 * 1024 * 1024)
    budget = int(vmem_limit * 0.85)          # headroom for compiler scratch

    # ---------- fused single-kernel fast path (small / medium batch) --------
    B_p8 = _round_up(B, 8)
    fused_bytes = (2 * emb_p * latent_p * 2
                   + B_p8 * emb_p * (2 + 4 + out_bytes)
                   + B_p8 * latent_p * 4
                   + 64 * 4 * (emb_p + latent_p))
    use_fused = (path == "fused") or (path == "auto" and 2 * fused_bytes <= budget)

    if use_fused:
        x_p = _pad2(x, B_p8, emb_p).astype(matmul_dtype)
        w1_p = _pad2(w1, emb_p, latent_p).astype(matmul_dtype)
        w2_p = _pad2(w2, latent_p, emb_p).astype(matmul_dtype)
        kern = functools.partial(
            _fused_kernel, inv_n=1.0 / B, n_rows=B, has_pad=(B_p8 != B),
            neg_slope=NEG_SLOPE, eps=BN_EPS)
        out_p = pl.pallas_call(
            kern,
            out_shape=jax.ShapeDtypeStruct((B_p8, emb_p), out_dtype),
            compiler_params=pltpu.CompilerParams(vmem_limit_bytes=vmem_limit),
        )(x_p, w1_p, _pad_vec(g1, latent_p), _pad_vec(b1, latent_p),
          w2_p, _pad_vec(g2, emb_p), _pad_vec(b2, emb_p))
        return out_p[:B, :emb]

    # ---------- tiled three-stage path ---------------------------------------
    if block_b is None:
        block_b = _choose_block_b(B, emb_p, latent_p, budget)
    block_b = max(256, _round_up(block_b, 256))

    nb_raw = pl.cdiv(B, block_b)
    n_split = 2 if nb_raw >= 2 else 1        # v7x: one half per TensorCore
    B_p = _round_up(B, block_b * n_split)
    nb_total = B_p // block_b
    nb_per = nb_total // n_split
    has_pad = B_p != B
    n_full_tiles = B // block_b              # tiles with no padded rows

    x_p = _pad2(x, B_p, emb_p).astype(matmul_dtype)
    w1_p = _pad2(w1, emb_p, latent_p).astype(matmul_dtype)
    w2_p = _pad2(w2, latent_p, emb_p).astype(matmul_dtype)

    # BN1 statistics WITHOUT an extra pass over x @ w1 (Gram-matrix trick):
    #   sum_i h[i,:]   = (sum_i x[i,:]) @ w1
    #   sum_i h[i,:]^2 = diag(w1^T (x^T x) w1)
    inv_n = 1.0 / B
    xf = x_p.astype(F32)
    w1f = w1_p.astype(F32)
    sum1 = jnp.sum(xf, axis=0, keepdims=True) @ w1f
    sq1 = jnp.sum(((xf.T @ xf) @ w1f) * w1f, axis=0, keepdims=True)
    mean1 = sum1 * inv_n
    var1 = jnp.maximum(sq1 * inv_n - mean1 * mean1, 0.0)
    scale1 = _pad_vec(g1, latent_p) * jax.lax.rsqrt(var1 + BN_EPS)
    shift1 = _pad_vec(b1, latent_p) - mean1 * scale1

    # ---- stage A -------------------------------------------------------------
    x_spec = pl.BlockSpec((block_b, emb_p), lambda c, i: (c * nb_per + i, 0))
    y_spec = pl.BlockSpec((block_b, emb_p), lambda c, i: (c * nb_per + i, 0))
    stat_spec = pl.BlockSpec((8, emb_p), lambda c, i: (c, 0))

    kern_mid = functools.partial(
        _mid_kernel, nb_per=nb_per, block_b=block_b, n_rows=B,
        n_full_tiles=n_full_tiles, has_pad=has_pad, neg_slope=NEG_SLOPE)

    y_raw, psum2, psq2 = pl.pallas_call(
        kern_mid,
        out_shape=(jax.ShapeDtypeStruct((B_p, emb_p), F32),
                   jax.ShapeDtypeStruct((8 * n_split, emb_p), F32),
                   jax.ShapeDtypeStruct((8 * n_split, emb_p), F32)),
        grid=(n_split, nb_per),
        in_specs=[x_spec,
                  _const_spec((emb_p, latent_p), lambda c, i: (0, 0)),
                  _const_spec((1, latent_p), lambda c, i: (0, 0)),
                  _const_spec((1, latent_p), lambda c, i: (0, 0)),
                  _const_spec((latent_p, emb_p), lambda c, i: (0, 0))],
        out_specs=(y_spec, stat_spec, stat_spec),
        compiler_params=pltpu.CompilerParams(
            dimension_semantics=("parallel", "arbitrary"),
            vmem_limit_bytes=vmem_limit),
    )(x_p, w1_p, scale1, shift1, w2_p)

    # ---- fold BN2 once in the wrapper ---------------------------------------
    sum2 = jnp.sum(psum2, axis=0, keepdims=True)
    sq2 = jnp.sum(psq2, axis=0, keepdims=True)
    mean2 = sum2 * inv_n
    var2 = jnp.maximum(sq2 * inv_n - mean2 * mean2, 0.0)
    scale2 = _pad_vec(g2, emb_p) * jax.lax.rsqrt(var2 + BN_EPS)
    shift2 = _pad_vec(b2, emb_p) - mean2 * scale2

    # ---- stage B: larger tile, fully parallel, aliases the y buffer ---------
    rows3 = _choose_pass3_rows(nb_total, block_b, emb_p, out_bytes, budget)
    y3_spec = pl.BlockSpec((rows3, emb_p), lambda i: (i, 0))
    alias = {0: 0} if out_dtype == jnp.dtype(jnp.float32) else {}
    out_p = pl.pallas_call(
        functools.partial(_bn_act_kernel, neg_slope=NEG_SLOPE),
        out_shape=jax.ShapeDtypeStruct((B_p, emb_p), out_dtype),
        grid=(B_p // rows3,),
        in_specs=[y3_spec,
                  _const_spec((1, emb_p), lambda i: (0, 0)),
                  _const_spec((1, emb_p), lambda i: (0, 0))],
        out_specs=y3_spec,
        input_output_aliases=alias,
        compiler_params=pltpu.CompilerParams(
            dimension_semantics=("parallel",),
            vmem_limit_bytes=vmem_limit),
    )(y_raw, scale2, shift2)

    return out_p[:B, :emb]


def predictor_reference(x, w1, g1, b1, w2, g2, b2, matmul_dtype=jnp.bfloat16):
    """Pure-JAX reference of the PyTorch training-mode forward, using the same
    bf16 matmul-operand rounding the kernel feeds the MXU (f32 everywhere else)."""
    xd = x.astype(matmul_dtype).astype(F32)
    w1d = w1.astype(matmul_dtype).astype(F32)
    w2d = w2.astype(matmul_dtype).astype(F32)
    h = xd @ w1d
    m, v = h.mean(0, keepdims=True), h.var(0, keepdims=True)   # biased var
    h = (h - m) / jnp.sqrt(v + BN_EPS) * g1 + b1
    h = jnp.where(h >= 0, h, NEG_SLOPE * h)
    y = h.astype(matmul_dtype).astype(F32) @ w2d
    m, v = y.mean(0, keepdims=True), y.var(0, keepdims=True)
    y = (y - m) / jnp.sqrt(v + BN_EPS) * g2 + b2
    return jnp.where(y >= 0, y, NEG_SLOPE * y)


if __name__ == "__main__":
    def make_inputs(key, B, EMB, LATENT):
        kx, k1, k2 = jax.random.split(key, 3)
        x = jax.random.normal(kx, (B, EMB), jnp.float32)
        bound1 = 1.0 / (EMB ** 0.5)
        w1 = jax.random.uniform(k1, (EMB, LATENT), jnp.float32, -bound1, bound1)
        bound2 = 1.0 / (LATENT ** 0.5)
        w2 = jax.random.uniform(k2, (LATENT, EMB), jnp.float32, -bound2, bound2)
        g1 = jnp.ones((1, LATENT), jnp.float32)
        b1 = jnp.zeros((1, LATENT), jnp.float32)
        g2 = jnp.ones((1, EMB), jnp.float32)
        b2 = jnp.zeros((1, EMB), jnp.float32)
        return x, w1, g1, b1, w2, g2, b2

    # Small demo shape -> fused single-kernel path.
    args = make_inputs(jax.random.PRNGKey(0), 8, 32, 64)
    out = jax.block_until_ready(predictor_forward(*args))
    ref = predictor_reference(*args)
    assert out.shape == (8, 32)
    assert jnp.allclose(out, ref, atol=2e-3, rtol=2e-3), "fused path mismatch"

    # Moderate shape -> tiled three-stage path (exercises the 2-way batch
    # split, padded-tile masking, Gram-matrix BN1 stats and the aliased epilogue).
    args2 = make_inputs(jax.random.PRNGKey(1), 600, 96, 160)
    out2 = jax.block_until_ready(
        predictor_forward(*args2, block_b=256, path="tiled"))
    ref2 = predictor_reference(*args2)
    assert out2.shape == (600, 96)
    assert jnp.allclose(out2, ref2, atol=2e-3, rtol=2e-3), "tiled path mismatch"

    print("KERNEL_OK")
</pallas_src>

<mosaic_0001>
module attributes {stable_mosaic.version = 11 : i64} {
  func.func @_fused_kernel(%arg0: memref<8x128xbf16, #tpu.memory_space<vmem>>, %arg1: memref<128x128xbf16, #tpu.memory_space<vmem>>, %arg2: memref<1x128xf32, #tpu.memory_space<vmem>>, %arg3: memref<1x128xf32, #tpu.memory_space<vmem>>, %arg4: memref<128x128xbf16, #tpu.memory_space<vmem>>, %arg5: memref<1x128xf32, #tpu.memory_space<vmem>>, %arg6: memref<1x128xf32, #tpu.memory_space<vmem>>, %arg7: memref<8x128xf32, #tpu.memory_space<vmem>>) attributes {dimension_semantics = [], scalar_prefetch = 0 : i64, scratch_operands = 0 : i64, tpu.core_type = #tpu.core_type<tc>} {
    %c0 = arith.constant 0 : index
    %c0_0 = arith.constant 0 : index
    %0 = vector.load %arg0[%c0, %c0_0] : memref<8x128xbf16, #tpu.memory_space<vmem>>, vector<8x128xbf16>
    %c0_1 = arith.constant 0 : index
    %c0_2 = arith.constant 0 : index
    %1 = vector.load %arg1[%c0_1, %c0_2] : memref<128x128xbf16, #tpu.memory_space<vmem>>, vector<128x128xbf16>
    %cst = arith.constant dense<0.000000e+00> : vector<8x128xf32>
    %2 = tpu.matmul %0, %1, %cst {dimension_numbers = #tpu.dot_dimension_numbers<[1], [0], [0], [1], [0, 0, 1, 1], [], []>} : vector<8x128xbf16>, vector<128x128xbf16>, vector<8x128xf32> -> vector<8x128xf32>
    %cst_3 = arith.constant dense<0.000000e+00> : vector<128xf32>
    %3 = vector.multi_reduction <add>, %2, %cst_3 [0] : vector<8x128xf32> to vector<128xf32>
    %4 = vector.shape_cast %3 : vector<128xf32> to vector<1x128xf32>
    %cst_4 = arith.constant 1.250000e-01 : f32
    %5 = vector.broadcast %cst_4 : f32 to vector<1x128xf32>
    %6 = arith.mulf %4, %5 : vector<1x128xf32>
    %7 = arith.mulf %2, %2 : vector<8x128xf32>
    %cst_5 = arith.constant dense<0.000000e+00> : vector<128xf32>
    %8 = vector.multi_reduction <add>, %7, %cst_5 [0] : vector<8x128xf32> to vector<128xf32>
    %9 = vector.shape_cast %8 : vector<128xf32> to vector<1x128xf32>
    %cst_6 = arith.constant 1.250000e-01 : f32
    %10 = vector.broadcast %cst_6 : f32 to vector<1x128xf32>
    %11 = arith.mulf %9, %10 : vector<1x128xf32>
    %12 = arith.mulf %6, %6 : vector<1x128xf32>
    %13 = arith.subf %11, %12 : vector<1x128xf32>
    %cst_7 = arith.constant 0.000000e+00 : f32
    %14 = vector.broadcast %cst_7 : f32 to vector<1x128xf32>
    %15 = arith.maximumf %13, %14 : vector<1x128xf32>
    %c0_8 = arith.constant 0 : index
    %c0_9 = arith.constant 0 : index
    %16 = vector.load %arg2[%c0_8, %c0_9] : memref<1x128xf32, #tpu.memory_space<vmem>>, vector<1x128xf32>
    %cst_10 = arith.constant 9.99999974E-6 : f32
    %17 = vector.broadcast %cst_10 : f32 to vector<1x128xf32>
    %18 = arith.addf %15, %17 : vector<1x128xf32>
    %19 = math.rsqrt %18 : vector<1x128xf32>
    %20 = arith.mulf %16, %19 : vector<1x128xf32>
    %c0_11 = arith.constant 0 : index
    %c0_12 = arith.constant 0 : index
    %21 = vector.load %arg3[%c0_11, %c0_12] : memref<1x128xf32, #tpu.memory_space<vmem>>, vector<1x128xf32>
    %22 = arith.mulf %6, %20 : vector<1x128xf32>
    %23 = arith.subf %21, %22 : vector<1x128xf32>
    %24 = vector.broadcast %20 : vector<1x128xf32> to vector<8x128xf32>
    %25 = arith.mulf %2, %24 : vector<8x128xf32>
    %26 = vector.broadcast %23 : vector<1x128xf32> to vector<8x128xf32>
    %27 = arith.addf %25, %26 : vector<8x128xf32>
    %cst_13 = arith.constant 1.000000e-01 : f32
    %28 = vector.broadcast %cst_13 : f32 to vector<8x128xf32>
    %29 = arith.mulf %28, %27 : vector<8x128xf32>
    %30 = arith.maximumf %27, %29 : vector<8x128xf32>
    %31 = arith.truncf %30 : vector<8x128xf32> to vector<8x128xbf16>
    %c0_14 = arith.constant 0 : index
    %c0_15 = arith.constant 0 : index
    %32 = vector.load %arg4[%c0_14, %c0_15] : memref<128x128xbf16, #tpu.memory_space<vmem>>, vector<128x128xbf16>
    %cst_16 = arith.constant dense<0.000000e+00> : vector<8x128xf32>
    %33 = tpu.matmul %31, %32, %cst_16 {dimension_numbers = #tpu.dot_dimension_numbers<[1], [0], [0], [1], [0, 0, 1, 1], [], []>} : vector<8x128xbf16>, vector<128x128xbf16>, vector<8x128xf32> -> vector<8x128xf32>
    %cst_17 = arith.constant dense<0.000000e+00> : vector<128xf32>
    %34 = vector.multi_reduction <add>, %33, %cst_17 [0] : vector<8x128xf32> to vector<128xf32>
    %35 = vector.shape_cast %34 : vector<128xf32> to vector<1x128xf32>
    %cst_18 = arith.constant 1.250000e-01 : f32
    %36 = vector.broadcast %cst_18 : f32 to vector<1x128xf32>
    %37 = arith.mulf %35, %36 : vector<1x128xf32>
    %38 = arith.mulf %33, %33 : vector<8x128xf32>
    %cst_19 = arith.constant dense<0.000000e+00> : vector<128xf32>
    %39 = vector.multi_reduction <add>, %38, %cst_19 [0] : vector<8x128xf32> to vector<128xf32>
    %40 = vector.shape_cast %39 : vector<128xf32> to vector<1x128xf32>
    %cst_20 = arith.constant 1.250000e-01 : f32
    %41 = vector.broadcast %cst_20 : f32 to vector<1x128xf32>
    %42 = arith.mulf %40, %41 : vector<1x128xf32>
    %43 = arith.mulf %37, %37 : vector<1x128xf32>
    %44 = arith.subf %42, %43 : vector<1x128xf32>
    %cst_21 = arith.constant 0.000000e+00 : f32
    %45 = vector.broadcast %cst_21 : f32 to vector<1x128xf32>
    %46 = arith.maximumf %44, %45 : vector<1x128xf32>
    %c0_22 = arith.constant 0 : index
    %c0_23 = arith.constant 0 : index
    %47 = vector.load %arg5[%c0_22, %c0_23] : memref<1x128xf32, #tpu.memory_space<vmem>>, vector<1x128xf32>
    %cst_24 = arith.constant 9.99999974E-6 : f32
    %48 = vector.broadcast %cst_24 : f32 to vector<1x128xf32>
    %49 = arith.addf %46, %48 : vector<1x128xf32>
    %50 = math.rsqrt %49 : vector<1x128xf32>
    %51 = arith.mulf %47, %50 : vector<1x128xf32>
    %c0_25 = arith.constant 0 : index
    %c0_26 = arith.constant 0 : index
    %52 = vector.load %arg6[%c0_25, %c0_26] : memref<1x128xf32, #tpu.memory_space<vmem>>, vector<1x128xf32>
    %53 = arith.mulf %37, %51 : vector<1x128xf32>
    %54 = arith.subf %52, %53 : vector<1x128xf32>
    %55 = vector.broadcast %51 : vector<1x128xf32> to vector<8x128xf32>
    %56 = arith.mulf %33, %55 : vector<8x128xf32>
    %57 = vector.broadcast %54 : vector<1x128xf32> to vector<8x128xf32>
    %58 = arith.addf %56, %57 : vector<8x128xf32>
    %cst_27 = arith.constant 1.000000e-01 : f32
    %59 = vector.broadcast %cst_27 : f32 to vector<8x128xf32>
    %60 = arith.mulf %59, %58 : vector<8x128xf32>
    %61 = arith.maximumf %58, %60 : vector<8x128xf32>
    %c0_28 = arith.constant 0 : index
    %c0_29 = arith.constant 0 : index
    %62 = vector.load %arg7[%c0_28, %c0_29] : memref<8x128xf32, #tpu.memory_space<vmem>>, vector<8x128xf32>
    tpu.vector_store %arg7[%c0_28, %c0_29], %61 {strides = array<i32>} : memref<8x128xf32, #tpu.memory_space<vmem>>, vector<8x128xf32>,
    return
  }
}

</mosaic_0001>

<bundles_post_ra>
// kernel: predictor_forward.1
= control target key start
LH: loop header
LB: loop body
LE: loop exit
PB: predicated region body
PF: predicated region fallthrough
CT: control target
= control target key end

     0   :  { %v456_v1 = vmov 0.0   ;;  %vm457_vm0 = vmmov 0   ;;  %s574_s0 = inlined_call_operand.vmem [shape: bf16[8,128], index: 0, kind: input, shape index: {}]   ;;  %s575_s1 = inlined_call_operand.vmem [shape: bf16[128,128], index: 1, kind: input, shape index: {}]   ;;  %s576_s2 = inlined_call_operand.vmem [shape: f32[1,128], index: 2, kind: input, shape index: {}]   ;;  %s577_s3 = inlined_call_operand.vmem [shape: f32[1,128], index: 3, kind: input, shape index: {}]   ;;  %s578_s4 = inlined_call_operand.vmem [shape: bf16[128,128], index: 4, kind: input, shape index: {}]   ;;  %s579_s5 = inlined_call_operand.vmem [shape: f32[1,128], index: 5, kind: input, shape index: {}]   ;;  %s580_s6 = inlined_call_operand.vmem [shape: f32[1,128], index: 6, kind: input, shape index: {}]   ;;  %s581_s7 = inlined_call_operand.hbm [shape: f32[8,128], index: 7, kind: output, shape index: {}]  }
   0x1   :  { %v412_v0 = vld [vmem:[%s575_s1] sm:$0xff]   ;;  %369 = vmatprep.subr.bf16.mxu0 %v456_v1  ;;  %389 = vmatprep.subr.bf16.mxu1 %v456_v1  ;;  %v413_v2 = vld [vmem:[%s575_s1 + $0x8] sm:$0xff]   ;;  %v414_v3 = vld [vmem:[%s575_s1 + $0x10] sm:$0xff]  }
   0x2   :  { %370 = vmatpush3.bf16.msra.mxu0 %v412_v0  ;;  %385 = vmatprep.mubr.msk.bf16.mxu0 %vm457_vm0, %v456_v1  ;;  %v415_v4 = vld [vmem:[%s575_s1 + $0x18] sm:$0xff]  }
   0x3   :  { %371 = vmatprep.subr.bf16.mxu0 %v456_v1  ;;  %405 = vmatprep.mubr.msk.bf16.mxu1 %vm457_vm0, %v456_v1 }
   0x6   :  { %372 = vmatpush3.bf16.msra.mxu0 %v413_v2 }
   0x7   :  { %373 = vmatprep.subr.bf16.mxu0 %v456_v1 }
   0xa   :  { %374 = vmatpush3.bf16.msra.mxu0 %v414_v3 }
   0xb   :  { %375 = vmatprep.subr.bf16.mxu0 %v456_v1 }
   0xc   :  { %12 = vsyncpa [#allocation3], 0  ;;  %v416_v5 = vld [vmem:[%s575_s1 + $0x20] sm:$0xff]   ;;  %v417_v6 = vld [vmem:[%s575_s1 + $0x28] sm:$0xff]   ;;  %v159_v41 = vlaneseq  ;;  %s458_s15 = smov [#allocation2]  }
   0xd   :  { %v418_v7 = vld [vmem:[%s575_s1 + $0x30] sm:$0xff]   ;;  %v419_v8 = vld [vmem:[%s575_s1 + $0x38] sm:$0xff]   ;;  %v28_v9 = vld [vmem:[%s574_s0] sm:$0xf]  ;;  %s327_s16 = sshll.u32 %s458_s15, 4  ;;  %s328_s16 = int_to_ptr.vmem [resolvable:$true] %s327_s16 }
   0xe   :  { %376 = vmatpush3.bf16.msra.mxu0 %v415_v4  ;;  %v420_v10 = vld [vmem:[%s578_s4] sm:$0xff]   ;;  %v421_v11 = vld [vmem:[%s578_s4 + $0x8] sm:$0xff]   ;;  %v422_v12 = vld [vmem:[%s578_s4 + $0x10] sm:$0xff]   ;;  %v160_v42 = vshrl.u32 %v159_v41, 7  ;;  %s432_s17 = scalar_lea.vmem %s328_s16, 128  ;;  %p437_p1 = scmp.lt.s32.totalorder %s328_s16, %s328_s16 }
   0xf   :  { %377 = vmatprep.subr.bf16.mxu0 %v456_v1  ;;  %390 = vmatpush3.bf16.msra.mxu1 %v420_v10  ;;  %v423_v13 = vld [vmem:[%s578_s4 + $0x18] sm:$0xff]   ;;  %v424_v14 = vld [vmem:[%s578_s4 + $0x20] sm:$0xff]   ;;  %v425_v15 = vld [vmem:[%s578_s4 + $0x28] sm:$0xff]   ;;  %p433_p0 = scmp.ne.s32.totalorder %s328_s16, %s432_s17  ;;  %p438_p2 = scmp.lt.s32.totalorder %s432_s17, %s432_s17 }
  0x10   :  { %391 = vmatprep.subr.bf16.mxu1 %v456_v1  ;;  %v426_v16 = vld [vmem:[%s578_s4 + $0x30] sm:$0xff]   ;;  %v427_v17 = vld [vmem:[%s578_s4 + $0x38] sm:$0xff]   ;;  %v151_v43 = vld [vmem:[%s576_s2] sm:$0x1]  ;;  %v161_v44 = vsub.s32 0, %v160_v42 }
  0x11   :  { %v155_v47 = vld [vmem:[%s577_s3] sm:$0x1]  ;;  %p439_p3 = por %p438_p2, %p437_p1 }
  0x12   :  { %378 = vmatpush3.bf16.msra.mxu0 %v416_v5 }
  0x13   :  { %379 = vmatprep.subr.bf16.mxu0 %v456_v1  ;;  %392 = vmatpush3.bf16.msra.mxu1 %v421_v11  ;;  %p440_p4 = pnand %p439_p3, %p433_p0 }
  0x14   :  { %393 = vmatprep.subr.bf16.mxu1 %v456_v1 }
  0x16   :  { %380 = vmatpush3.bf16.msra.mxu0 %v417_v6 }
  0x17   :  { %381 = vmatprep.subr.bf16.mxu0 %v456_v1  ;;  %394 = vmatpush3.bf16.msra.mxu1 %v422_v12 }
  0x18   :  { %395 = vmatprep.subr.bf16.mxu1 %v456_v1 }
  0x1a   :  { %382 = vmatpush3.bf16.msra.mxu0 %v418_v7 }
  0x1b   :  { %383 = vmatprep.subr.bf16.mxu0 %v456_v1  ;;  %396 = vmatpush3.bf16.msra.mxu1 %v423_v13 }
  0x1c   :  { %397 = vmatprep.subr.bf16.mxu1 %v456_v1 }
  0x1e   :  { %384 = vmatpush3.bf16.msra.mxu0 %v419_v8 }
  0x1f   :  { %398 = vmatpush3.bf16.msra.mxu1 %v424_v14 }
  0x20   :  { %399 = vmatprep.subr.bf16.mxu1 %v456_v1 }
  0x21   :  { %386 = vmatmul.mubr.bf16.vlgmr.msra.gmra.mrb[0].mxu0 %v28_v9 }
  0x23   :  { %400 = vmatpush3.bf16.msra.mxu1 %v425_v15 }
  0x24   :  { %401 = vmatprep.subr.bf16.mxu1 %v456_v1 }
  0x27   :  { %402 = vmatpush3.bf16.msra.mxu1 %v426_v16  ;;  %v297_v16 = vld [vmem:[%s579_s5] sm:$0x1] }
  0x28   :  { %403 = vmatprep.subr.bf16.mxu1 %v456_v1 }
  0x2b   :  { %404 = vmatpush3.bf16.msra.mxu1 %v427_v17 }
  0xf4   :  { %v127_v18 = vpop.f32.mrb[0].mxu0 }
  0xf5   :  { %v133_v19 = vrot.slane %v127_v18, 4  ;;  %v140_v20 = vmul.f32 %v127_v18, %v127_v18  ;;  %v387_v21 = vpop.f32.mrb[1].mxu0 }
  0xf6   :  { %v130_v22 = vpop.f32.mrb[2].mxu0 }
  0xf7   :  { %v134_v23 = vadd.f32 %v133_v19, %v127_v18  ;;  %v141_v24 = vrot.slane %v140_v20, 4  ;;  %v388_v25 = vpop.f32.mrb[3].mxu0  ;;  %v301_v19 = vld [vmem:[%s580_s6] sm:$0x1] }
  0xf9   :  { %v135_v26 = vrot.slane %v134_v23, 2  ;;  %v142_v27 = vadd.f32 %v141_v24, %v140_v20 }
  0xfb   :  { %v136_v28 = vadd.f32 %v135_v26, %v134_v23  ;;  %v143_v29 = vrot.slane %v142_v27, 2 }
  0xfd   :  { %v137_v30 = vrot.slane %v136_v28, 1  ;;  %v144_v31 = vadd.f32 %v143_v29, %v142_v27 }
  0xff   :  { %v138_v32 = vadd.f32 %v137_v30, %v136_v28  ;;  %v145_v33 = vrot.slane %v144_v31, 1 }
 0x101   :  { %v139_v34 = vmul.f32 0.125, %v138_v32  ;;  %v146_v35 = vadd.f32 %v145_v33, %v144_v31 }
 0x103   :  { %v147_v36 = vmul.f32 0.125, %v146_v35  ;;  %v148_v37 = vmul.f32 %v139_v34, %v139_v34 }
 0x105   :  { %v149_v38 = vsub.f32 %v147_v36, %v148_v37 }
 0x107   :  { %v150_v39 = vmax.f32 %v149_v38, 0.0 }
 0x109   :  { %v152_v40 = vadd.f32 1e-05, %v150_v39 }
 0x10b   :  { %428 = vrsqrt.f32 %v152_v40 }
 0x115   :  { %v429_v45 = vpop.eup %428 }
 0x116   :  { %v154_v46 = vmul.f32 %v429_v45, %v151_v43 }
 0x118   :  { %v156_v48 = vmul.f32 %v154_v46, %v139_v34  ;;  %v162_v49 = vrot.slane %v154_v46, %v161_v44 }
 0x11a   :  { %v157_v50 = vsub.f32 %v155_v47, %v156_v48  ;;  %v164_v51 = vmul.f32 %v162_v49, %v127_v18 }
 0x11c   :  { %v169_v52 = vrot.slane %v157_v50, %v161_v44 }
 0x11e   :  { %v171_v53 = vadd.f32 %v169_v52, %v164_v51 }
 0x120   :  { %v172_v54 = vmul.f32 0.1, %v171_v53 }
 0x122   :  { %v173_v55 = vmax.f32 %v171_v53, %v172_v54 }
 0x124   :  { %v174_v56 = vpack.c.bf16 %v173_v55, %v173_v55 }
 0x126   :  { %406 = vmatmul.mubr.bf16.vlgmr.msra.gmra.mrb[0].mxu1 %v174_v56 }
 0x1f9   :  { %v273_v57 = vpop.f32.mrb[0].mxu1 }
 0x1fa   :  { %v279_v58 = vrot.slane %v273_v57, 4  ;;  %v286_v59 = vmul.f32 %v273_v57, %v273_v57  ;;  %v407_v60 = vpop.f32.mrb[1].mxu1 }
 0x1fb   :  { %v276_v61 = vpop.f32.mrb[2].mxu1 }
 0x1fc   :  { %v280_v62 = vadd.f32 %v279_v58, %v273_v57  ;;  %v287_v63 = vrot.slane %v286_v59, 4  ;;  %v408_v0 = vpop.f32.mrb[3].mxu1 }
 0x1fe   :  { %v281_v1 = vrot.slane %v280_v62, 2  ;;  %v288_v2 = vadd.f32 %v287_v63, %v286_v59 }
 0x200   :  { %v282_v3 = vadd.f32 %v281_v1, %v280_v62  ;;  %v289_v4 = vrot.slane %v288_v2, 2 }
 0x202   :  { %v283_v5 = vrot.slane %v282_v3, 1  ;;  %v290_v6 = vadd.f32 %v289_v4, %v288_v2 }
 0x204   :  { %v284_v7 = vadd.f32 %v283_v5, %v282_v3  ;;  %v291_v8 = vrot.slane %v290_v6, 1 }
 0x206   :  { %v285_v9 = vmul.f32 0.125, %v284_v7  ;;  %v292_v10 = vadd.f32 %v291_v8, %v290_v6 }
 0x208   :  { %v293_v11 = vmul.f32 0.125, %v292_v10  ;;  %v294_v12 = vmul.f32 %v285_v9, %v285_v9 }
 0x20a   :  { %v295_v13 = vsub.f32 %v293_v11, %v294_v12 }
 0x20c   :  { %v296_v14 = vmax.f32 %v295_v13, 0.0 }
 0x20e   :  { %v298_v15 = vadd.f32 1e-05, %v296_v14 }
 0x210   :  { %430 = vrsqrt.f32 %v298_v15 }
 0x21a   :  { %v431_v17 = vpop.eup %430 }
 0x21b   :  { %v300_v18 = vmul.f32 %v431_v17, %v297_v16 }
 0x21d   :  { %v308_v20 = vrot.slane %v300_v18, %v161_v44  ;;  %v302_v21 = vmul.f32 %v300_v18, %v285_v9 }
 0x21f   :  { %v303_v22 = vsub.f32 %v301_v19, %v302_v21  ;;  %v310_v23 = vmul.f32 %v308_v20, %v273_v57 }
 0x221   :  { %v315_v24 = vrot.slane %v303_v22, %v161_v44 }
 0x223   :  { %v317_v25 = vadd.f32 %v315_v24, %v310_v23 }
 0x225   :  { %v318_v26 = vmul.f32 0.1, %v317_v25 }
 0x227   :  { %v319_v27 = vmax.f32 %v317_v25, %v318_v26 }
 0x229   :  { %320 = vst [vmem:[#allocation2] sm:$0xff] %v319_v27 }
 0x22a   :  { %443 = shalt.err (!%p440_p4)
}
 0x22b   :  { %s444_s18 = scalar_lea.hbm %s581_s7, 128 }
 0x22c   :  { %p445_p5 = scmp.ne.s32.totalorder %s581_s7, %s444_s18  ;;  %p448_p6 = scmp.lt.u32.totalorder %s444_s18, %s581_s7 }
 0x22e   :  { %p450_p7 = pnand %p448_p6, %p445_p5 }
 0x230   :  { %453 = shalt.err (!%p450_p7)
}
 0x231   :  { %330 = dma.vmem_to_hbm [thread:$0]  %s328_s16, 128, %s581_s7, [#allocation3]  }
 0x232   :  { %454 = dma.done.wait [#allocation3], 128  }
 0x233   :  { %455 = vsyncadd [#allocation3], 4294967168 }
 0x234   :  { %334 = vsyncpa [#allocation3], 1 }

</bundles_post_ra>
